<compile_context>
chip_gen: v5e
topology: v5e:2x2
jax: 0.10.0
libtpu: 0.0.40
codegen_flags: <defaults>
</compile_context>

<pallas_src>
import functools

import jax
import jax.numpy as jnp
from jax.experimental import pallas as pl
from jax.experimental.pallas import tpu as pltpu


# ---------------------------------------------------------------------------
# Chip detection -- only used to pick tile size / compute dtype; every fallback
# is safe on every TPU generation.
# ---------------------------------------------------------------------------
def _device_kind() -> str:
    try:
        return jax.devices()[0].device_kind.lower()
    except Exception:  # pragma: no cover
        return ""


_KIND = _device_kind()
_IS_V7 = ("v7" in _KIND) or ("tpu7" in _KIND)
_IS_V5E = ("v5e" in _KIND) or ("v5 lite" in _KIND) or ("v5lite" in _KIND)

# v7x: larger tiles to amortize the ~0.35 us per-grid-step overhead at 3.2 TB/s.
# v5e/v6e: 2 MiB keeps 4 double-buffered tiles inside the default scoped VMEM.
_TARGET_TILE_BYTES = (4 if _IS_V7 else 2) * 1024 * 1024
# Explicit VMEM headroom on v7x (64 MiB physical / 32 MiB default scoped).
_VMEM_LIMIT_BYTES = 48 * 1024 * 1024 if _IS_V7 else None
# TODO(synk): sweep pipeline_mode=pl.Buffered(3) on the input spec for v7x once
# a trace shows exposed DMA; kept at the default double-buffering here.


def _sigmoid_kernel(x_ref, o_ref, *, compute_dtype):
    x = x_ref[...].astype(compute_dtype)
    # sigmoid(x) == 0.5 * (tanh(0.5 * x) + 1): single EUP op, no VALU divide.
    y = 0.5 * (jnp.tanh(0.5 * x) + 1.0)
    o_ref[...] = y.astype(o_ref.dtype)


def _compute_dtype(dtype):
    """bf16 native compute on v6e/v7x; f32 everywhere else (incl. v5e)."""
    if jnp.dtype(dtype) == jnp.bfloat16 and not _IS_V5E:
        return jnp.bfloat16
    return jnp.float32


def _sublane_quantum(dtype):
    """Sublane packing quantum: 8 for 4-byte, 16 for 2-byte, 32 for 1-byte."""
    return max(8, 32 // jnp.dtype(dtype).itemsize)


def _choose_cols(n):
    """Widest lane-dense column count dividing n, or None if n % 128 != 0."""
    for c in (1024, 512, 256, 128):
        if n % c == 0:
            return c
    return None


def _choose_block_rows(rows, cols, itemsize, sub):
    if rows <= sub:
        return rows  # single full-extent block (always a legal block shape)
    br = max(sub, (_TARGET_TILE_BYTES // (cols * itemsize)) // sub * sub)
    # Keep >=2 (prefer >=4) grid steps when the array is big enough, so the
    # "parallel" axis feeds both v7x TensorCores and DMA overlaps compute.
    for steps in (4, 2):
        if rows >= steps * sub:
            br = min(br, max(sub, (rows // steps) // sub * sub))
            break
    return min(br, (rows // sub) * sub)


def sigmoid(x):
    """Elementwise sigmoid via Pallas. Accepts any shape / float dtype."""
    orig_shape = x.shape
    dtype = x.dtype
    n = x.size
    if n == 0:
        return x

    kernel = functools.partial(_sigmoid_kernel, compute_dtype=_compute_dtype(dtype))
    itemsize = jnp.dtype(dtype).itemsize

    cols = _choose_cols(n)
    x_flat = jnp.ravel(x)
    trim = False

    if cols is None:
        # Element count not a multiple of 128.
        if n * itemsize <= 2 * 1024 * 1024:
            # Small: single full-extent (1, n) block -- no pad/slice HBM copies.
            out = pl.pallas_call(
                kernel,
                out_shape=jax.ShapeDtypeStruct((1, n), dtype),
            )(x_flat.reshape(1, n))
            return out.reshape(orig_shape)
        # Rare large-and-unaligned case: pad the tail to a multiple of 128.
        # TODO(synk): replace with an in-kernel masked tail store (scalar-
        # prefetched true length) to drop the extra pad/slice HBM passes.
        cols = 128
        n_pad = pl.cdiv(n, cols) * cols
        x_flat = jnp.pad(x_flat, (0, n_pad - n))
        trim = True
    else:
        n_pad = n

    rows = n_pad // cols
    x2d = x_flat.reshape(rows, cols)

    sub = _sublane_quantum(dtype)
    block_rows = _choose_block_rows(rows, cols, itemsize, sub)
    grid = (pl.cdiv(rows, block_rows),)

    out2d = pl.pallas_call(
        kernel,
        out_shape=jax.ShapeDtypeStruct((rows, cols), dtype),
        grid_spec=pltpu.PrefetchScalarGridSpec(
            num_scalar_prefetch=0,
            grid=grid,
            in_specs=[pl.BlockSpec((block_rows, cols), lambda i: (i, 0))],
            out_specs=pl.BlockSpec((block_rows, cols), lambda i: (i, 0)),
        ),
        compiler_params=pltpu.CompilerParams(
            dimension_semantics=("parallel",),   # megacore-shardable on v7x
            vmem_limit_bytes=_VMEM_LIMIT_BYTES,
        ),
    )(x2d)

    out_flat = out2d.reshape(-1)
    if trim:
        out_flat = out_flat[:n]
    return out_flat.reshape(orig_shape)


if __name__ == "__main__":
    key = jax.random.PRNGKey(0)

    # Primary test: NCHW f32, 128-aligned element count -> lane-dense 2D path.
    x = jax.random.normal(key, (2, 4, 16, 16), dtype=jnp.float32)
    out = jax.block_until_ready(sigmoid(x))
    ref = jax.nn.sigmoid(x)
    assert out.shape == x.shape and out.dtype == x.dtype
    assert jnp.allclose(out, ref, atol=1e-6, rtol=1e-6)

    # Unaligned element count (3*7*11 = 231) -> copy-free full-extent block.
    x_odd = jax.random.normal(jax.random.fold_in(key, 1), (3, 7, 11), dtype=jnp.float32)
    out_odd = jax.block_until_ready(sigmoid(x_odd))
    assert out_odd.shape == x_odd.shape and out_odd.dtype == x_odd.dtype
    assert jnp.allclose(out_odd, jax.nn.sigmoid(x_odd), atol=1e-6, rtol=1e-6)

    # bf16 input: native bf16 compute on v6e/v7x, f32 upcast on v5e.
    x_bf16 = jax.random.normal(jax.random.fold_in(key, 2), (8, 128), dtype=jnp.bfloat16)
    out_bf16 = jax.block_until_ready(sigmoid(x_bf16))
    assert out_bf16.shape == x_bf16.shape and out_bf16.dtype == jnp.bfloat16
    assert jnp.allclose(out_bf16.astype(jnp.float32),
                        jax.nn.sigmoid(x_bf16).astype(jnp.float32),
                        atol=3e-2, rtol=5e-2)

    print("KERNEL_OK")
</pallas_src>

<mosaic_0001>
module attributes {stable_mosaic.version = 11 : i64} {
  func.func @_sigmoid_kernel(%arg0: i32, %arg1: memref<2x1024xf32, #tpu.memory_space<vmem>>, %arg2: memref<2x1024xf32, #tpu.memory_space<vmem>>) attributes {dimension_semantics = [#tpu.dimension_semantics<parallel>], iteration_bounds = array<i64: 1>, scalar_prefetch = 0 : i64, scratch_operands = 0 : i64, tpu.core_type = #tpu.core_type<tc>, window_params = [{transform_indices = @transform_0, window_bounds = array<i64: 2, 1024>}, {transform_indices = @transform_1, window_bounds = array<i64: 2, 1024>}]} {
    %c0 = arith.constant 0 : index
    %c0_0 = arith.constant 0 : index
    %0 = vector.load %arg1[%c0, %c0_0] : memref<2x1024xf32, #tpu.memory_space<vmem>>, vector<2x1024xf32>
    %cst = arith.constant 5.000000e-01 : f32
    %1 = vector.broadcast %cst : f32 to vector<2x1024xf32>
    %2 = arith.mulf %1, %0 : vector<2x1024xf32>
    %3 = math.tanh %2 : vector<2x1024xf32>
    %cst_1 = arith.constant 1.000000e+00 : f32
    %4 = vector.broadcast %cst_1 : f32 to vector<2x1024xf32>
    %5 = arith.addf %3, %4 : vector<2x1024xf32>
    %cst_2 = arith.constant 5.000000e-01 : f32
    %6 = vector.broadcast %cst_2 : f32 to vector<2x1024xf32>
    %7 = arith.mulf %6, %5 : vector<2x1024xf32>
    %c0_3 = arith.constant 0 : index
    %c0_4 = arith.constant 0 : index
    %8 = vector.load %arg2[%c0_3, %c0_4] : memref<2x1024xf32, #tpu.memory_space<vmem>>, vector<2x1024xf32>
    tpu.vector_store %arg2[%c0_3, %c0_4], %7 {strides = array<i32>} : memref<2x1024xf32, #tpu.memory_space<vmem>>, vector<2x1024xf32>,
    return
  }
  func.func @transform_0(%arg0: i32) -> (i32, i32) {
    %c0_i32 = arith.constant 0 : i32
    %c0_i32_0 = arith.constant 0 : i32
    return %arg0, %c0_i32 : i32, i32
  }
  func.func @transform_1(%arg0: i32) -> (i32, i32) {
    %c0_i32 = arith.constant 0 : i32
    %c0_i32_0 = arith.constant 0 : i32
    return %arg0, %c0_i32 : i32, i32
  }
}

</mosaic_0001>

<bundles_post_ra>
// kernel: tpu_custom_call.1
= control target key start
LH: loop header
LB: loop body
LE: loop exit
PB: predicated region body
PF: predicated region fallthrough
CT: control target
= control target key end

     0   :  { %6 = vsyncpa [#allocation3], 0  ;;  %s128_s0 = inlined_call_operand.hbm [shape: f32[2,1024], index: 0, kind: input, shape index: {}]   ;;  %s129_s1 = inlined_call_operand.hbm [shape: f32[2,1024], index: 1, kind: output, shape index: {}]  }
   0x1   :  { %7 = vsyncpa [#allocation4], 0  ;;  %s13_s8 = sshll.u32 %s128_s0, 4  ;;  %s110_s9 = smov [#allocation2]   ;;  %s14_s8 = int_to_ptr.hbm [resolvable:$true] %s13_s8 }
   0x2   :  { %s15_s10 = sshll.u32 %s110_s9, 4  ;;  %s16_s10 = int_to_ptr.vmem [resolvable:$true] %s15_s10 }
   0x3   :  { %18 = dma.hbm_to_vmem [thread:$0]  %s14_s8, 256, %s16_s10, [#allocation3]  }
   0x4   :  { %106 = dma.done.wait [#allocation3], 256  }
   0x5   :  { %107 = vsyncadd [#allocation3], 4294967040  ;;  %v23_v0 = vld [vmem:[#allocation2] sm:$0xff]  ;;  %v24_v1 = vld [vmem:[#allocation2 + $0x8] sm:$0xff]  ;;  %s111_s11 = smov [#allocation5]   ;;  %s42_s14 = sshll.u32 %s129_s1, 4  ;;  %s43_s14 = int_to_ptr.hbm [resolvable:$true] %s42_s14 }
   0x6   :  { %v25_v2 = vmul.f32 0.5, %v23_v0  ;;  %v26_v3 = vmul.f32 0.5, %v24_v1  ;;  %s40_s12 = sshll.u32 %s111_s11, 4  ;;  %s41_s12 = int_to_ptr.vmem [resolvable:$true] %s40_s12 }
   0x8   :  { %54 = vtanh.f32 %v25_v2 }
   0x9   :  { %56 = vtanh.f32 %v26_v3 }
   0xe   :  { %v55_v4 = vpop.eup %54 }
   0xf   :  { %v57_v5 = vpop.eup %56  ;;  %v29_v6 = vadd.f32 1.0, %v55_v4 }
  0x10   :  { %v30_v7 = vadd.f32 1.0, %v57_v5 }
  0x11   :  { %v31_v8 = vmul.f32 0.5, %v29_v6 }
  0x12   :  { %v32_v9 = vmul.f32 0.5, %v30_v7 }
  0x13   :  { %33 = vst [vmem:[#allocation5] sm:$0xff] %v31_v8 }
  0x14   :  { %34 = vst [vmem:[#allocation5 + $0x8] sm:$0xff] %v32_v9 }
  0x15   :  { %45 = dma.vmem_to_hbm [thread:$0]  %s41_s12, 256, %s43_s14, [#allocation4]  }
  0x16   :  { %108 = dma.done.wait [#allocation4], 256  }
  0x17   :  { %109 = vsyncadd [#allocation4], 4294967040 }
  0x18   :  { %50 = vsyncpa [#allocation3], 1 }
  0x19   :  { %51 = vsyncpa [#allocation4], 1 }

</bundles_post_ra>
